<compile_context>
chip_gen: v7x
topology: tpu7x:2x2x1
jax: 0.10.0
libtpu: 0.0.40
codegen_flags: <defaults>
</compile_context>

<pallas_src>
import jax
import jax.numpy as jnp
from jax.experimental import pallas as pl
from jax.experimental.pallas import tpu as pltpu


# ----------------------------------------------------------------------------
# Fused MLP kernel:
#   h1 = relu(x @ W1 + b1)          (MXU, f32 accumulate)
#   h2 = relu(h1 @ W2 + b2)         (MXU, f32 accumulate)
#   out = sum(h2 * w3_row, -1) + b3 (VPU mul + XLU lane reduce; MXU left idle)
# One batch tile per grid step; output written as a lane-dense (1, tb) row.
# ----------------------------------------------------------------------------
def housing_mlp_kernel(x_ref, w1_ref, b1_ref, w2_ref, b2_ref, w3_ref, b3_ref, o_ref):
    # x_ref : (TB, D)
    # w1_ref: (D, 128)    b1_ref: (1, 128)
    # w2_ref: (128, 64)   b2_ref: (1, 64)
    # w3_ref: (1, 64)     b3_ref: (1,)  f32 scalar in SMEM
    # o_ref : (1, TB)     lane-dense output row (batch on lanes)
    h1 = jnp.dot(x_ref[...], w1_ref[...], preferred_element_type=jnp.float32)
    h1 = jnp.maximum(h1 + b1_ref[...], 0.0)

    h2 = jnp.dot(h1, w2_ref[...], preferred_element_type=jnp.float32)
    h2 = jnp.maximum(h2 + b2_ref[...], 0.0)

    # Final layer has a single output feature: avoid an N=1 MXU matmul.
    out = jnp.sum(h2 * w3_ref[...], axis=-1)          # (TB,)  VPU + XLU
    out = out[None, :] + b3_ref[0]                    # (1, TB), batch on lanes
    o_ref[...] = out.astype(o_ref.dtype)


def _pick_batch_tile(B, max_batch_tile, min_grid_steps):
    """Sublane-aligned batch tile.

    - Whole batch in one tile when it fits (each grid step costs ~0.35us).
    - Multi-tile grids keep tb a multiple of 128 so the (1, tb) lane-dense
      output block stays aligned against the (1, Bp) output array.
    - min_grid_steps > 1 (v7x: 2 TensorCores) caps tb so the "parallel"
      grid axis has at least that many tiles to shard.
    """
    tb = max(8, min(pl.next_power_of_2(max(B, 1)), max_batch_tile))
    if min_grid_steps > 1 and B > 128:
        cap = pl.cdiv(pl.cdiv(B, min_grid_steps), 128) * 128
        tb = min(tb, max(cap, 128))
    if pl.cdiv(B, tb) > 1:
        tb = max((tb // 128) * 128, 128)
    return tb


def housing_regressor_forward(x, params, *, max_batch_tile=2048, min_grid_steps=1):
    """x: (B, D) float -> (B,) predictions. Matches HousingRegressor.forward."""
    B, D = x.shape
    w1, b1 = params["w1"], params["b1"]
    w2, b2 = params["w2"], params["b2"]
    w3, b3 = params["w3"], params["b3"]
    H1, H2 = w1.shape[1], w2.shape[1]          # 128, 64

    tb = _pick_batch_tile(B, max_batch_tile, min_grid_steps)
    Bp = pl.cdiv(B, tb) * tb
    if Bp != B:
        x = jnp.pad(x, ((0, Bp - B), (0, 0)))  # padded rows sliced off below

    out = pl.pallas_call(
        housing_mlp_kernel,
        out_shape=jax.ShapeDtypeStruct((1, Bp), x.dtype),
        grid=(Bp // tb,),
        in_specs=[
            pl.BlockSpec((tb, D), lambda i: (i, 0)),    # x tile (varies with batch)
            pl.BlockSpec((D, H1), lambda i: (0, 0)),    # weights: constant index_map
            pl.BlockSpec((1, H1), lambda i: (0, 0)),    #   -> VMEM-resident across tiles
            pl.BlockSpec((H1, H2), lambda i: (0, 0)),
            pl.BlockSpec((1, H2), lambda i: (0, 0)),
            pl.BlockSpec((1, H2), lambda i: (0, 0)),    # w3 as a (1, 64) row (VPU path)
            pl.BlockSpec(memory_space=pltpu.MemorySpace.SMEM),  # b3 scalar in SMEM
        ],
        # Lane-dense output: batch lands on the lane axis -> unmasked vst stores.
        out_specs=pl.BlockSpec((1, tb), lambda i: (0, i)),
        compiler_params=pltpu.CompilerParams(
            dimension_semantics=("parallel",),  # independent batch tiles (v7x 2-TC split)
        ),
    )(
        x,
        w1, b1.reshape(1, H1),
        w2, b2.reshape(1, H2),
        w3.reshape(1, H2),      # (64, 1) column -> (1, 64) row
        b3.reshape(1),
    )
    # PyTorch: self.net(x).squeeze(1) -> shape (B,)
    return out[0, :B]


housing_regressor_forward_jit = jax.jit(
    housing_regressor_forward, static_argnames=("max_batch_tile", "min_grid_steps")
)


def init_params(key, input_dim):
    ks = jax.random.split(key, 6)
    f32 = jnp.float32
    return {
        # weights stored as (in, out) so the kernel does x @ W (== x @ W_pt.T)
        "w1": 0.1 * jax.random.normal(ks[0], (input_dim, 128), f32),
        "b1": 0.01 * jax.random.normal(ks[1], (128,), f32),
        "w2": 0.1 * jax.random.normal(ks[2], (128, 64), f32),
        "b2": 0.01 * jax.random.normal(ks[3], (64,), f32),
        "w3": 0.1 * jax.random.normal(ks[4], (64, 1), f32),
        "b3": 0.01 * jax.random.normal(ks[5], (1,), f32),
    }


def _reference_forward(x, params):
    h1 = jnp.maximum(x @ params["w1"] + params["b1"], 0.0)
    h2 = jnp.maximum(h1 @ params["w2"] + params["b2"], 0.0)
    # Mathematically identical to (h2 @ w3 + b3).squeeze(1).
    return jnp.sum(h2 * params["w3"][:, 0], axis=-1) + params["b3"][0]


if __name__ == "__main__":
    key = jax.random.PRNGKey(0)
    k_x, k_p, k_x2 = jax.random.split(key, 3)

    # California-Housing-like: 8 features.
    batch, input_dim = 8, 8
    x = jax.random.normal(k_x, (batch, input_dim), jnp.float32)
    params = init_params(k_p, input_dim)

    y = housing_regressor_forward_jit(x, params)
    jax.block_until_ready(y)
    assert y.shape == (batch,), y.shape
    y_ref = _reference_forward(x, params)
    assert jnp.allclose(y, y_ref, atol=2e-3, rtol=2e-3), (y, y_ref)

    # Also exercise the multi-tile (grid > 1) path with an unaligned batch.
    batch2 = 300
    x2 = jax.random.normal(k_x2, (batch2, input_dim), jnp.float32)
    y2 = housing_regressor_forward_jit(x2, params, max_batch_tile=128)
    jax.block_until_ready(y2)
    assert y2.shape == (batch2,), y2.shape
    y2_ref = _reference_forward(x2, params)
    assert jnp.allclose(y2, y2_ref, atol=2e-3, rtol=2e-3), (y2, y2_ref)

    print("KERNEL_OK")
</pallas_src>

<mosaic_0001>
module attributes {stable_mosaic.version = 11 : i64} {
  func.func @housing_mlp_kernel(%arg0: i32, %arg1: memref<8x8xf32, #tpu.memory_space<vmem>>, %arg2: memref<8x128xf32, #tpu.memory_space<vmem>>, %arg3: memref<1x128xf32, #tpu.memory_space<vmem>>, %arg4: memref<128x64xf32, #tpu.memory_space<vmem>>, %arg5: memref<1x64xf32, #tpu.memory_space<vmem>>, %arg6: memref<1x64xf32, #tpu.memory_space<vmem>>, %arg7: memref<1xf32, #tpu.memory_space<smem>>, %arg8: memref<1x8xf32, #tpu.memory_space<vmem>>) attributes {dimension_semantics = [#tpu.dimension_semantics<parallel>], iteration_bounds = array<i64: 1>, scalar_prefetch = 0 : i64, scratch_operands = 0 : i64, tpu.core_type = #tpu.core_type<tc>, window_params = [{transform_indices = @transform_0, window_bounds = array<i64: 8, 8>}, {pipeline_mode = #tpu.pipeline_mode<synchronous>, transform_indices = @transform_1, window_bounds = array<i64: 8, 128>}, {pipeline_mode = #tpu.pipeline_mode<synchronous>, transform_indices = @transform_2, window_bounds = array<i64: 1, 128>}, {pipeline_mode = #tpu.pipeline_mode<synchronous>, transform_indices = @transform_3, window_bounds = array<i64: 128, 64>}, {pipeline_mode = #tpu.pipeline_mode<synchronous>, transform_indices = @transform_4, window_bounds = array<i64: 1, 64>}, {pipeline_mode = #tpu.pipeline_mode<synchronous>, transform_indices = @transform_5, window_bounds = array<i64: 1, 64>}, {transform_indices = @transform_6, window_bounds = array<i64: 1>}, {transform_indices = @transform_7, window_bounds = array<i64: 1, 8>}]} {
    %c0 = arith.constant 0 : index
    %c0_0 = arith.constant 0 : index
    %0 = vector.load %arg1[%c0, %c0_0] : memref<8x8xf32, #tpu.memory_space<vmem>>, vector<8x8xf32>
    %c0_1 = arith.constant 0 : index
    %c0_2 = arith.constant 0 : index
    %1 = vector.load %arg2[%c0_1, %c0_2] : memref<8x128xf32, #tpu.memory_space<vmem>>, vector<8x128xf32>
    %cst = arith.constant dense<0.000000e+00> : vector<8x128xf32>
    %2 = tpu.matmul %0, %1, %cst {dimension_numbers = #tpu.dot_dimension_numbers<[1], [0], [0], [1], [0, 0, 1, 1], [], []>} : vector<8x8xf32>, vector<8x128xf32>, vector<8x128xf32> -> vector<8x128xf32>
    %c0_3 = arith.constant 0 : index
    %c0_4 = arith.constant 0 : index
    %3 = vector.load %arg3[%c0_3, %c0_4] : memref<1x128xf32, #tpu.memory_space<vmem>>, vector<1x128xf32>
    %4 = vector.broadcast %3 : vector<1x128xf32> to vector<8x128xf32>
    %5 = arith.addf %2, %4 : vector<8x128xf32>
    %cst_5 = arith.constant 0.000000e+00 : f32
    %6 = vector.broadcast %cst_5 : f32 to vector<8x128xf32>
    %7 = arith.maximumf %5, %6 : vector<8x128xf32>
    %c0_6 = arith.constant 0 : index
    %c0_7 = arith.constant 0 : index
    %8 = vector.load %arg4[%c0_6, %c0_7] : memref<128x64xf32, #tpu.memory_space<vmem>>, vector<128x64xf32>
    %cst_8 = arith.constant dense<0.000000e+00> : vector<8x64xf32>
    %9 = tpu.matmul %7, %8, %cst_8 {dimension_numbers = #tpu.dot_dimension_numbers<[1], [0], [0], [1], [0, 0, 1, 1], [], []>} : vector<8x128xf32>, vector<128x64xf32>, vector<8x64xf32> -> vector<8x64xf32>
    %c0_9 = arith.constant 0 : index
    %c0_10 = arith.constant 0 : index
    %10 = vector.load %arg5[%c0_9, %c0_10] : memref<1x64xf32, #tpu.memory_space<vmem>>, vector<1x64xf32>
    %11 = vector.broadcast %10 : vector<1x64xf32> to vector<8x64xf32>
    %12 = arith.addf %9, %11 : vector<8x64xf32>
    %cst_11 = arith.constant 0.000000e+00 : f32
    %13 = vector.broadcast %cst_11 : f32 to vector<8x64xf32>
    %14 = arith.maximumf %12, %13 : vector<8x64xf32>
    %c0_12 = arith.constant 0 : index
    %c0_13 = arith.constant 0 : index
    %15 = vector.load %arg6[%c0_12, %c0_13] : memref<1x64xf32, #tpu.memory_space<vmem>>, vector<1x64xf32>
    %16 = vector.broadcast %15 : vector<1x64xf32> to vector<8x64xf32>
    %17 = arith.mulf %14, %16 : vector<8x64xf32>
    %cst_14 = arith.constant dense<0.000000e+00> : vector<8xf32>
    %18 = vector.multi_reduction <add>, %17, %cst_14 [1] : vector<8x64xf32> to vector<8xf32>
    %19 = vector.shape_cast %18 : vector<8xf32> to vector<1x8xf32>
    %c0_15 = arith.constant 0 : index
    %20 = memref.load %arg7[%c0_15] : memref<1xf32, #tpu.memory_space<smem>>
    %21 = vector.broadcast %20 : f32 to vector<1x8xf32>
    %22 = arith.addf %19, %21 : vector<1x8xf32>
    %c0_16 = arith.constant 0 : index
    %c0_17 = arith.constant 0 : index
    %23 = vector.load %arg8[%c0_16, %c0_17] : memref<1x8xf32, #tpu.memory_space<vmem>>, vector<1x8xf32>
    tpu.vector_store %arg8[%c0_16, %c0_17], %22 {strides = array<i32>} : memref<1x8xf32, #tpu.memory_space<vmem>>, vector<1x8xf32>,
    return
  }
  func.func @transform_0(%arg0: i32) -> (i32, i32) {
    %c0_i32 = arith.constant 0 : i32
    %c0_i32_0 = arith.constant 0 : i32
    return %arg0, %c0_i32 : i32, i32
  }
  func.func @transform_1(%arg0: i32) -> (i32, i32) {
    %c0_i32 = arith.constant 0 : i32
    %c0_i32_0 = arith.constant 0 : i32
    %c0_i32_1 = arith.constant 0 : i32
    return %c0_i32, %c0_i32_0 : i32, i32
  }
  func.func @transform_2(%arg0: i32) -> (i32, i32) {
    %c0_i32 = arith.constant 0 : i32
    %c0_i32_0 = arith.constant 0 : i32
    %c0_i32_1 = arith.constant 0 : i32
    return %c0_i32, %c0_i32_0 : i32, i32
  }
  func.func @transform_3(%arg0: i32) -> (i32, i32) {
    %c0_i32 = arith.constant 0 : i32
    %c0_i32_0 = arith.constant 0 : i32
    %c0_i32_1 = arith.constant 0 : i32
    return %c0_i32, %c0_i32_0 : i32, i32
  }
  func.func @transform_4(%arg0: i32) -> (i32, i32) {
    %c0_i32 = arith.constant 0 : i32
    %c0_i32_0 = arith.constant 0 : i32
    %c0_i32_1 = arith.constant 0 : i32
    return %c0_i32, %c0_i32_0 : i32, i32
  }
  func.func @transform_5(%arg0: i32) -> (i32, i32) {
    %c0_i32 = arith.constant 0 : i32
    %c0_i32_0 = arith.constant 0 : i32
    %c0_i32_1 = arith.constant 0 : i32
    return %c0_i32, %c0_i32_0 : i32, i32
  }
  func.func @transform_6(%arg0: i32) -> i32 {
    %c0_i32 = arith.constant 0 : i32
    %c0_i32_0 = arith.constant 0 : i32
    return %c0_i32 : i32
  }
  func.func @transform_7(%arg0: i32) -> (i32, i32) {
    %c0_i32 = arith.constant 0 : i32
    %c0_i32_0 = arith.constant 0 : i32
    return %c0_i32, %arg0 : i32, i32
  }
}

</mosaic_0001>

<bundles_post_ra>
// kernel: housing_regressor_forward.1
= control target key start
LH: loop header
LB: loop body
LE: loop exit
PB: predicated region body
PF: predicated region fallthrough
CT: control target
= control target key end

     0   :  { %vm37_vm0 = vcmask 64512   ;;  %v360_v2 = vmov 0.0   ;;  %vm361_vm1 = vmmov 0   ;;  %v362_v6 = vmov 0.0|0.0   ;;  %s482_s0 = inlined_call_operand.vmem [shape: f32[8,8], index: 0, kind: input, shape index: {}]   ;;  %s483_s1 = inlined_call_operand.vmem [shape: f32[8,128], index: 1, kind: input, shape index: {}]   ;;  %s484_s2 = inlined_call_operand.vmem [shape: f32[1,128], index: 2, kind: input, shape index: {}]   ;;  %s485_s3 = inlined_call_operand.vmem [shape: f32[128,64], index: 3, kind: input, shape index: {}]   ;;  %s486_s4 = inlined_call_operand.vmem [shape: f32[1,64], index: 4, kind: input, shape index: {}]   ;;  %s487_s5 = inlined_call_operand.vmem [shape: f32[1,64], index: 5, kind: input, shape index: {}]   ;;  %s488_s6 = inlined_call_operand.<no memory space> [shape: f32[1], index: 6, kind: input, shape index: {}]   ;;  %s489_s7 = inlined_call_operand.hbm [shape: f32[1,8], index: 7, kind: output, shape index: {}]  }
   0x1   :  { %v29_v0 = vld [vmem:[%s483_s1] sm:$0xff]  ;;  %268 = vmatprep.subr.mxu0 %v360_v2  ;;  %270 = vmatprep.mubr.msk.f32.mxu0 %vm361_vm1, %v360_v2  ;;  %v113_v4 = vld [vmem:[%s485_s3 + $0x8] sm:$0xff]  ;;  %v114_v5 = vld [vmem:[%s485_s3 + $0x10] sm:$0xff] }
   0x2   :  { %v28_v1 = vld [vmem:[%s482_s0] sm:$0xff]  ;;  %269 = vmatpush3.msra.mxu0 %v29_v0  ;;  %308 = vmatprep.subr.bf16.mxu1 %v362_v6  ;;  %v115_v8 = vld [vmem:[%s485_s3 + $0x18] sm:$0xff]  ;;  %v117_v11 = vld [vmem:[%s485_s3 + $0x28] sm:$0xff] }
   0x3   :  { %v112_v3 = vld [vmem:[%s485_s3] sm:$0xff]  ;;  %271 = vmatmul.mubr.msk.f32.vlgmr.msra.gmra.mrb[0].mxu0 %vm37_vm0, %v28_v1  ;;  %305 = vmatprep.mubr.msk.f32.mxu1 %vm361_vm1, %v360_v2  ;;  %v312_v9 = vpack.c.bf16 %v115_v8, %v114_v5 }
   0x4   :  { %v309_v7 = vpack.c.bf16 %v113_v4, %v112_v3  ;;  %v116_v10 = vld [vmem:[%s485_s3 + $0x20] sm:$0xff] }
   0x6   :  { %310 = vmatpush3.bf16.msra.mxu1 %v309_v7 }
   0x7   :  { %311 = vmatprep.subr.bf16.mxu1 %v362_v6 }
   0x8   :  { %13 = vsyncpa [#allocation4], 0  ;;  %v315_v12 = vpack.c.bf16 %v117_v11, %v116_v10  ;;  %v118_v13 = vld [vmem:[%s485_s3 + $0x30] sm:$0xff]  ;;  %v119_v14 = vld [vmem:[%s485_s3 + $0x38] sm:$0xff]  ;;  %vm214_vm2 = vcmask 523264   ;;  %v222_v41 = vlaneseq  ;;  %v219_v44 = vstv %s488_s6 }
   0x9   :  { %v318_v15 = vpack.c.bf16 %v119_v14, %v118_v13  ;;  %v120_v16 = vld [vmem:[%s485_s3 + $0x40] sm:$0xff]  ;;  %v121_v17 = vld [vmem:[%s485_s3 + $0x48] sm:$0xff]  ;;  %v122_v19 = vld [vmem:[%s485_s3 + $0x50] sm:$0xff]  ;;  %vm229_vm3 = vcmask 57344  }
   0xa   :  { %313 = vmatpush3.bf16.msra.mxu1 %v312_v9  ;;  %v321_v18 = vpack.c.bf16 %v121_v17, %v120_v16  ;;  %v123_v20 = vld [vmem:[%s485_s3 + $0x58] sm:$0xff]  ;;  %v124_v22 = vld [vmem:[%s485_s3 + $0x60] sm:$0xff]  ;;  %v125_v23 = vld [vmem:[%s485_s3 + $0x68] sm:$0xff]  ;;  %v223_v42 = vand.u32 127, %v222_v41  ;;  %v225_v43 = vshrl.u32 %v222_v41, 7 }
   0xb   :  { %314 = vmatprep.subr.bf16.mxu1 %v362_v6  ;;  %v324_v21 = vpack.c.bf16 %v123_v20, %v122_v19  ;;  %v327_v24 = vpack.c.bf16 %v125_v23, %v124_v22  ;;  %v126_v25 = vld [vmem:[%s485_s3 + $0x70] sm:$0xff]  ;;  %v127_v26 = vld [vmem:[%s485_s3 + $0x78] sm:$0xff]  ;;  %v245_v28 = vld [vmem:[%s484_s2] ss:$0 sm:$0xff] }
   0xc   :  { %v330_v27 = vpack.c.bf16 %v127_v26, %v126_v25  ;;  %v247_v33 = vld [vmem:[%s486_s4] ss:$0 sm:$0xff]  ;;  %v226_v45 = vsub.s32 %v223_v42, %v225_v43  ;;  %s363_s4 = smov [#allocation3]  }
   0xd   :  { %v248_v37 = vld [vmem:[%s487_s5] ss:$0 sm:$0xff]  ;;  %s237_s16 = sshll.u32 %s363_s4, 4  ;;  %s238_s16 = int_to_ptr.vmem [resolvable:$true] %s237_s16 }
   0xe   :  { %316 = vmatpush3.bf16.msra.mxu1 %v315_v12  ;;  %s336_s5 = scalar_lea.vmem %s238_s16, 16  ;;  %s340_s17 = scalar_lea.vmem %s238_s16, 32 }
   0xf   :  { %317 = vmatprep.subr.bf16.mxu1 %v362_v6  ;;  %p337_p0 = scmp.ne.s32.totalorder %s238_s16, %s336_s5  ;;  %p341_p1 = scmp.lt.s32.totalorder %s238_s16, %s238_s16 }
  0x10   :  { %p342_p2 = scmp.lt.s32.totalorder %s340_s17, %s336_s5 }
  0x12   :  { %319 = vmatpush3.bf16.msra.mxu1 %v318_v15  ;;  %p343_p3 = por %p342_p2, %p341_p1 }
  0x13   :  { %320 = vmatprep.subr.bf16.mxu1 %v362_v6 }
  0x14   :  { %p344_p4 = pnand %p343_p3, %p337_p0 }
  0x16   :  { %322 = vmatpush3.bf16.msra.mxu1 %v321_v18 }
  0x17   :  { %323 = vmatprep.subr.bf16.mxu1 %v362_v6 }
  0x1a   :  { %325 = vmatpush3.bf16.msra.mxu1 %v324_v21 }
  0x1b   :  { %326 = vmatprep.subr.bf16.mxu1 %v362_v6 }
  0x1e   :  { %328 = vmatpush3.bf16.msra.mxu1 %v327_v24 }
  0x1f   :  { %329 = vmatprep.subr.bf16.mxu1 %v362_v6 }
  0x22   :  { %331 = vmatpush3.bf16.msra.mxu1 %v330_v27 }
  0xd6   :  { %v107_v29 = vpop.f32.mrb[0].mxu0 }
  0xd7   :  { %v108_v30 = vadd.f32 %v245_v28, %v107_v29  ;;  %v272_v31 = vpop.f32.mrb[1].mxu0 }
  0xd9   :  { %v111_v32 = vmax.f32 %v108_v30, 0.0 }
  0xdb   :  { %306 = vmatmul.mubr.f32.vlgmr.msra.gmra.mrb[0].mxu1 %v111_v32 }
 0x1ae   :  { %v201_v34 = vpop.f32.mrb[0].mxu1 }
 0x1af   :  { %v202_v35 = vadd.f32 %v247_v33, %v201_v34  ;;  %v307_v36 = vpop.f32.mrb[1].mxu1 }
 0x1b1   :  { %v205_v38 = vmax.f32 %v202_v35, 0.0 }
 0x1b3   :  { %v213_v39 = vmul.f32 %v248_v37, %v205_v38 }
 0x1b5   :  { %v215_v40 = vsel %vm214_vm2, %v213_v39, 0.0 }
 0x1b6   :  { %216 = vadd.xlane.f32.xlu0 %v215_v40 }
 0x243   :  { %v217_v46 = vpop.xlane.xlu0 %216 }
 0x244   :  { %v220_v47 = vadd.f32 %v219_v44, %v217_v46 }
 0x246   :  { %v227_v48 = vrot.slane %v220_v47, %v226_v45 }
 0x248   :  { %230 = vst.msk [vmem:[#allocation3] sm:$0x1] %vm229_vm3, %v227_v48 }
 0x249   :  { %347 = shalt.err (!%p344_p4)
}
 0x24a   :  { %s348_s6 = scalar_lea.hbm %s489_s7, 16 }
 0x24b   :  { %p349_p5 = scmp.ne.s32.totalorder %s489_s7, %s348_s6  ;;  %p352_p6 = scmp.lt.u32.totalorder %s348_s6, %s489_s7 }
 0x24d   :  { %p354_p7 = pnand %p352_p6, %p349_p5 }
 0x24f   :  { %357 = shalt.err (!%p354_p7)
}
 0x250   :  { %240 = dma.vmem_to_hbm [thread:$0]  %s238_s16, 16, %s489_s7, [#allocation4]  }
 0x251   :  { %358 = dma.done.wait [#allocation4], 16  }
 0x252   :  { %359 = vsyncadd [#allocation4], 4294967280 }
 0x253   :  { %244 = vsyncpa [#allocation4], 1 }

</bundles_post_ra>
